<compile_context>
chip_gen: v5e
topology: v5e:2x2
jax: 0.10.0
libtpu: 0.0.40
codegen_flags: <defaults>
</compile_context>

<pallas_src>
import functools

import jax
import jax.numpy as jnp
from jax import lax
from jax.experimental import pallas as pl
from jax.experimental.pallas import tpu as pltpu

# ---------------- model hyper-parameters (small, deterministic) ----------------
VOCAB_SIZE = 50
EMBED_DIM = 32
N_FILTERS = 8
FILTER_SIZES = (3, 4, 5)
OUTPUT_DIM = 4
PAD_IDX = 0
BATCH = 2
SEQ_LEN = 16


def _cnn_kernel(ids_ref, table_ref, wtap_ref, bias_ref, fcw_ref, fcb_ref,
                out_ref, emb_pad_ref, *, batch, seq_len, vocab,
                n_filters, filter_sizes):
    B, S = batch, seq_len
    BS = B * S
    NF3 = len(filter_sizes) * n_filters
    fs_max = max(filter_sizes)
    pad_rows = emb_pad_ref.shape[0]
    E = table_ref.shape[1]

    # ---- embedding lookup fused into the kernel as a one-hot MXU matmul ----
    ids = ids_ref[...]                                          # (BS, 1) int32
    onehot = (lax.broadcasted_iota(jnp.int32, (BS, vocab), 1) == ids
              ).astype(jnp.float32)                             # (BS, V)
    emb = jnp.dot(onehot, table_ref[...],
                  preferred_element_type=jnp.float32)           # (BS, E)

    # Zero-padded copy so tap-shifted windows past the end read zeros.
    emb_pad_ref[0:BS, :] = emb
    emb_pad_ref[BS:, :] = jnp.zeros((pad_rows - BS, E), jnp.float32)
    emb_pad = emb_pad_ref[...]                                  # (pad_rows, E)

    # ---- all three conv banks fused: one (BS,E)x(E,3F) matmul per tap ----
    # wtap[k] holds tap-k weights of every filter bank side by side (zero
    # columns for banks whose filter is shorter than k+1), already transposed.
    acc = jnp.zeros((BS, NF3), jnp.float32)
    for k in range(fs_max):
        acc = acc + jnp.dot(emb_pad[k:k + BS, :], wtap_ref[k],
                            preferred_element_type=jnp.float32)
    acc = jnp.maximum(acc + bias_ref[...], 0.0)                 # bias + ReLU

    # ---- mask invalid tail windows, then max-over-time pool per example ----
    acc3 = acc.reshape(B, S, NF3)
    t = lax.broadcasted_iota(jnp.int32, (B, S, NF3), 1)
    col = lax.broadcasted_iota(jnp.int32, (B, S, NF3), 2)
    vlens = [S - fs + 1 for fs in filter_sizes]                 # valid windows/bank
    valid_len = jnp.full((B, S, NF3), vlens[-1], jnp.int32)
    for g in reversed(range(len(filter_sizes) - 1)):
        valid_len = jnp.where(col < (g + 1) * n_filters, vlens[g], valid_len)
    acc3 = jnp.where(t < valid_len, acc3, -jnp.inf)
    pooled = jnp.max(acc3, axis=1)                              # (B, 3F)

    # ---- classifier (dropout is identity in eval mode) ----
    out_ref[...] = (jnp.dot(pooled, fcw_ref[...],
                            preferred_element_type=jnp.float32)
                    + fcb_ref[...])                             # (B, O)


def prepare_kernel_params(params):
    """One-time re-layout of the torch-style parameters for the kernel."""
    F, E = N_FILTERS, EMBED_DIM
    fs_max = max(FILTER_SIZES)
    nf3 = len(FILTER_SIZES) * F
    wtap = jnp.zeros((fs_max, E, nf3), jnp.float32)
    for g, fs in enumerate(FILTER_SIZES):
        w = params[f"w{g}"]                                     # (F, fs, E)
        wtap = wtap.at[:fs, :, g * F:(g + 1) * F].set(jnp.transpose(w, (1, 2, 0)))
    bias = jnp.concatenate(
        [params[f"b{g}"] for g in range(len(FILTER_SIZES))], axis=1)  # (1, 3F)
    return {
        "table": params["embedding"].astype(jnp.float32),       # (V, E)
        "wtap": wtap,                                           # (fs_max, E, 3F)
        "bias": bias,                                           # (1, 3F)
        "fc_w": params["fc_w"],                                 # (3F, O)
        "fc_b": params["fc_b"],                                 # (1, O)
    }


def cnn_forward(text, kparams):
    """text: int32 [B, S] token ids.  Returns float32 [B, OUTPUT_DIM] logits."""
    B, S = text.shape
    BS = B * S
    V, E = kparams["table"].shape
    F = N_FILTERS
    NF3 = len(FILTER_SIZES) * F
    O = OUTPUT_DIM
    fs_max = max(FILTER_SIZES)
    pad_rows = ((BS + fs_max - 1 + 7) // 8) * 8                 # sublane-aligned

    ids2d = text.reshape(BS, 1).astype(jnp.int32)

    kernel = functools.partial(
        _cnn_kernel, batch=B, seq_len=S, vocab=V,
        n_filters=F, filter_sizes=FILTER_SIZES)

    def full_spec(shape):
        return pl.BlockSpec(shape, lambda i: (0,) * len(shape))

    out = pl.pallas_call(
        kernel,
        out_shape=jax.ShapeDtypeStruct((B, O), jnp.float32),
        grid=(1,),            # whole batch in one step: working set is a few KB
        in_specs=[
            full_spec((BS, 1)),
            full_spec((V, E)),
            full_spec((fs_max, E, NF3)),
            full_spec((1, NF3)),
            full_spec((NF3, O)),
            full_spec((1, O)),
        ],
        out_specs=full_spec((B, O)),
        scratch_shapes=[pltpu.VMEM((pad_rows, E), jnp.float32)],
    )(ids2d, kparams["table"], kparams["wtap"], kparams["bias"],
      kparams["fc_w"], kparams["fc_b"])
    return out


def _reference_forward(text, params):
    """Pure-JAX reference (same math as the PyTorch forward, eval mode)."""
    emb = jnp.take(params["embedding"], text, axis=0)           # (B, S, E)
    pooled = []
    for w, b, fs in ((params["w0"], params["b0"], FILTER_SIZES[0]),
                     (params["w1"], params["b1"], FILTER_SIZES[1]),
                     (params["w2"], params["b2"], FILTER_SIZES[2])):
        L = SEQ_LEN - fs + 1
        acc = jnp.zeros((text.shape[0], L, N_FILTERS), jnp.float32)
        for k in range(fs):
            acc = acc + jnp.einsum("bse,fe->bsf", emb[:, k:k + L, :], w[:, k, :])
        acc = jnp.maximum(acc + b, 0.0)
        pooled.append(jnp.max(acc, axis=1))
    cat = jnp.concatenate(pooled, axis=1)
    return cat @ params["fc_w"] + params["fc_b"]


def init_params(key):
    ks = jax.random.split(key, 8)
    emb = 0.1 * jax.random.normal(ks[0], (VOCAB_SIZE, EMBED_DIM), jnp.float32)
    emb = emb.at[PAD_IDX].set(0.0)  # padding_idx row zeroed (as in nn.Embedding)
    params = {"embedding": emb}
    for i, fs in enumerate(FILTER_SIZES):
        params[f"w{i}"] = 0.1 * jax.random.normal(
            ks[1 + i], (N_FILTERS, fs, EMBED_DIM), jnp.float32)
        params[f"b{i}"] = 0.01 * jnp.ones((1, N_FILTERS), jnp.float32) * (i + 1)
    # torch Linear weight is (out, in); we store the transpose (in, out).
    params["fc_w"] = 0.1 * jax.random.normal(
        ks[4], (len(FILTER_SIZES) * N_FILTERS, OUTPUT_DIM), jnp.float32)
    params["fc_b"] = 0.01 * jnp.ones((1, OUTPUT_DIM), jnp.float32)
    return params


if __name__ == "__main__":
    key = jax.random.PRNGKey(0)
    params = init_params(key)
    kparams = prepare_kernel_params(params)
    text = jax.random.randint(jax.random.PRNGKey(1), (BATCH, SEQ_LEN),
                              minval=0, maxval=VOCAB_SIZE, dtype=jnp.int32)

    out = cnn_forward(text, kparams)
    out = jax.block_until_ready(out)

    ref = _reference_forward(text, params)
    assert out.shape == (BATCH, OUTPUT_DIM), out.shape
    assert jnp.allclose(out, ref, atol=1e-4, rtol=1e-4), (out, ref)
    print("KERNEL_OK")
</pallas_src>

<mosaic_0001>
module attributes {stable_mosaic.version = 11 : i64} {
  func.func @_cnn_kernel(%arg0: i32, %arg1: memref<32x1xi32, #tpu.memory_space<vmem>>, %arg2: memref<50x32xf32, #tpu.memory_space<vmem>>, %arg3: memref<5x32x24xf32, #tpu.memory_space<vmem>>, %arg4: memref<1x24xf32, #tpu.memory_space<vmem>>, %arg5: memref<24x4xf32, #tpu.memory_space<vmem>>, %arg6: memref<1x4xf32, #tpu.memory_space<vmem>>, %arg7: memref<2x4xf32, #tpu.memory_space<vmem>>, %arg8: memref<40x32xf32, #tpu.memory_space<vmem>>) attributes {dimension_semantics = [#tpu.dimension_semantics<arbitrary>], iteration_bounds = array<i64: 1>, scalar_prefetch = 0 : i64, scratch_operands = 1 : i64, tpu.core_type = #tpu.core_type<tc>, window_params = [{pipeline_mode = #tpu.pipeline_mode<synchronous>, transform_indices = @transform_0, window_bounds = array<i64: 32, 1>}, {pipeline_mode = #tpu.pipeline_mode<synchronous>, transform_indices = @transform_1, window_bounds = array<i64: 50, 32>}, {pipeline_mode = #tpu.pipeline_mode<synchronous>, transform_indices = @transform_2, window_bounds = array<i64: 5, 32, 24>}, {pipeline_mode = #tpu.pipeline_mode<synchronous>, transform_indices = @transform_3, window_bounds = array<i64: 1, 24>}, {pipeline_mode = #tpu.pipeline_mode<synchronous>, transform_indices = @transform_4, window_bounds = array<i64: 24, 4>}, {pipeline_mode = #tpu.pipeline_mode<synchronous>, transform_indices = @transform_5, window_bounds = array<i64: 1, 4>}, {pipeline_mode = #tpu.pipeline_mode<synchronous>, transform_indices = @transform_6, window_bounds = array<i64: 2, 4>}]} {
    %c0 = arith.constant 0 : index
    %c0_0 = arith.constant 0 : index
    %0 = vector.load %arg1[%c0, %c0_0] : memref<32x1xi32, #tpu.memory_space<vmem>>, vector<32x1xi32>
    %1 = tpu.iota {dimensions = array<i32: 1>} : vector<32x50xi32>
    %2 = vector.broadcast %0 : vector<32x1xi32> to vector<32x50xi32>
    %3 = arith.cmpi eq, %1, %2 : vector<32x50xi32>
    %4 = arith.extui %3 : vector<32x50xi1> to vector<32x50xi32>
    %5 = arith.sitofp %4 : vector<32x50xi32> to vector<32x50xf32>
    %c0_1 = arith.constant 0 : index
    %c0_2 = arith.constant 0 : index
    %6 = vector.load %arg2[%c0_1, %c0_2] : memref<50x32xf32, #tpu.memory_space<vmem>>, vector<50x32xf32>
    %cst = arith.constant dense<0.000000e+00> : vector<32x32xf32>
    %7 = tpu.matmul %5, %6, %cst {dimension_numbers = #tpu.dot_dimension_numbers<[1], [0], [0], [1], [0, 0, 1, 1], [], []>} : vector<32x50xf32>, vector<50x32xf32>, vector<32x32xf32> -> vector<32x32xf32>
    %c0_3 = arith.constant 0 : index
    %c0_4 = arith.constant 0 : index
    %8 = vector.load %arg8[%c0_3, %c0_4] : memref<40x32xf32, #tpu.memory_space<vmem>>, vector<32x32xf32>
    tpu.vector_store %arg8[%c0_3, %c0_4], %7 {strides = array<i32>} : memref<40x32xf32, #tpu.memory_space<vmem>>, vector<32x32xf32>,
    %cst_5 = arith.constant 0.000000e+00 : f32
    %9 = vector.broadcast %cst_5 : f32 to vector<8x32xf32>
    %c32 = arith.constant 32 : index
    %c0_6 = arith.constant 0 : index
    %10 = vector.load %arg8[%c32, %c0_6] : memref<40x32xf32, #tpu.memory_space<vmem>>, vector<8x32xf32>
    tpu.vector_store %arg8[%c32, %c0_6], %9 {strides = array<i32>} : memref<40x32xf32, #tpu.memory_space<vmem>>, vector<8x32xf32>,
    %c0_7 = arith.constant 0 : index
    %c0_8 = arith.constant 0 : index
    %11 = vector.load %arg8[%c0_7, %c0_8] : memref<40x32xf32, #tpu.memory_space<vmem>>, vector<40x32xf32>
    %cst_9 = arith.constant 0.000000e+00 : f32
    %12 = vector.broadcast %cst_9 : f32 to vector<32x24xf32>
    %13 = vector.extract_strided_slice %11 {offsets = [0, 0], sizes = [32, 32], strides = [1, 1]} : vector<40x32xf32> to vector<32x32xf32>
    %c0_10 = arith.constant 0 : index
    %c0_11 = arith.constant 0 : index
    %c0_12 = arith.constant 0 : index
    %14 = vector.load %arg3[%c0_10, %c0_11, %c0_12] : memref<5x32x24xf32, #tpu.memory_space<vmem>>, vector<1x32x24xf32>
    %15 = vector.shape_cast %14 : vector<1x32x24xf32> to vector<32x24xf32>
    %cst_13 = arith.constant dense<0.000000e+00> : vector<32x24xf32>
    %16 = tpu.matmul %13, %15, %cst_13 {dimension_numbers = #tpu.dot_dimension_numbers<[1], [0], [0], [1], [0, 0, 1, 1], [], []>} : vector<32x32xf32>, vector<32x24xf32>, vector<32x24xf32> -> vector<32x24xf32>
    %17 = arith.addf %12, %16 : vector<32x24xf32>
    %18 = vector.extract_strided_slice %11 {offsets = [1, 0], sizes = [32, 32], strides = [1, 1]} : vector<40x32xf32> to vector<32x32xf32>
    %c1 = arith.constant 1 : index
    %c0_14 = arith.constant 0 : index
    %c0_15 = arith.constant 0 : index
    %19 = vector.load %arg3[%c1, %c0_14, %c0_15] : memref<5x32x24xf32, #tpu.memory_space<vmem>>, vector<1x32x24xf32>
    %20 = vector.shape_cast %19 : vector<1x32x24xf32> to vector<32x24xf32>
    %cst_16 = arith.constant dense<0.000000e+00> : vector<32x24xf32>
    %21 = tpu.matmul %18, %20, %cst_16 {dimension_numbers = #tpu.dot_dimension_numbers<[1], [0], [0], [1], [0, 0, 1, 1], [], []>} : vector<32x32xf32>, vector<32x24xf32>, vector<32x24xf32> -> vector<32x24xf32>
    %22 = arith.addf %17, %21 : vector<32x24xf32>
    %23 = vector.extract_strided_slice %11 {offsets = [2, 0], sizes = [32, 32], strides = [1, 1]} : vector<40x32xf32> to vector<32x32xf32>
    %c2 = arith.constant 2 : index
    %c0_17 = arith.constant 0 : index
    %c0_18 = arith.constant 0 : index
    %24 = vector.load %arg3[%c2, %c0_17, %c0_18] : memref<5x32x24xf32, #tpu.memory_space<vmem>>, vector<1x32x24xf32>
    %25 = vector.shape_cast %24 : vector<1x32x24xf32> to vector<32x24xf32>
    %cst_19 = arith.constant dense<0.000000e+00> : vector<32x24xf32>
    %26 = tpu.matmul %23, %25, %cst_19 {dimension_numbers = #tpu.dot_dimension_numbers<[1], [0], [0], [1], [0, 0, 1, 1], [], []>} : vector<32x32xf32>, vector<32x24xf32>, vector<32x24xf32> -> vector<32x24xf32>
    %27 = arith.addf %22, %26 : vector<32x24xf32>
    %28 = vector.extract_strided_slice %11 {offsets = [3, 0], sizes = [32, 32], strides = [1, 1]} : vector<40x32xf32> to vector<32x32xf32>
    %c3 = arith.constant 3 : index
    %c0_20 = arith.constant 0 : index
    %c0_21 = arith.constant 0 : index
    %29 = vector.load %arg3[%c3, %c0_20, %c0_21] : memref<5x32x24xf32, #tpu.memory_space<vmem>>, vector<1x32x24xf32>
    %30 = vector.shape_cast %29 : vector<1x32x24xf32> to vector<32x24xf32>
    %cst_22 = arith.constant dense<0.000000e+00> : vector<32x24xf32>
    %31 = tpu.matmul %28, %30, %cst_22 {dimension_numbers = #tpu.dot_dimension_numbers<[1], [0], [0], [1], [0, 0, 1, 1], [], []>} : vector<32x32xf32>, vector<32x24xf32>, vector<32x24xf32> -> vector<32x24xf32>
    %32 = arith.addf %27, %31 : vector<32x24xf32>
    %33 = vector.extract_strided_slice %11 {offsets = [4, 0], sizes = [32, 32], strides = [1, 1]} : vector<40x32xf32> to vector<32x32xf32>
    %c4 = arith.constant 4 : index
    %c0_23 = arith.constant 0 : index
    %c0_24 = arith.constant 0 : index
    %34 = vector.load %arg3[%c4, %c0_23, %c0_24] : memref<5x32x24xf32, #tpu.memory_space<vmem>>, vector<1x32x24xf32>
    %35 = vector.shape_cast %34 : vector<1x32x24xf32> to vector<32x24xf32>
    %cst_25 = arith.constant dense<0.000000e+00> : vector<32x24xf32>
    %36 = tpu.matmul %33, %35, %cst_25 {dimension_numbers = #tpu.dot_dimension_numbers<[1], [0], [0], [1], [0, 0, 1, 1], [], []>} : vector<32x32xf32>, vector<32x24xf32>, vector<32x24xf32> -> vector<32x24xf32>
    %37 = arith.addf %32, %36 : vector<32x24xf32>
    %c0_26 = arith.constant 0 : index
    %c0_27 = arith.constant 0 : index
    %38 = vector.load %arg4[%c0_26, %c0_27] : memref<1x24xf32, #tpu.memory_space<vmem>>, vector<1x24xf32>
    %39 = vector.broadcast %38 : vector<1x24xf32> to vector<32x24xf32>
    %40 = arith.addf %37, %39 : vector<32x24xf32>
    %cst_28 = arith.constant 0.000000e+00 : f32
    %41 = vector.broadcast %cst_28 : f32 to vector<32x24xf32>
    %42 = arith.maximumf %40, %41 : vector<32x24xf32>
    %43 = vector.shape_cast %42 : vector<32x24xf32> to vector<2x16x24xf32>
    %44 = tpu.iota {dimensions = array<i32: 1>} : vector<2x16x24xi32>
    %45 = tpu.iota {dimensions = array<i32: 2>} : vector<2x16x24xi32>
    %c12_i32 = arith.constant 12 : i32
    %46 = vector.broadcast %c12_i32 : i32 to vector<2x16x24xi32>
    %c16_i32 = arith.constant 16 : i32
    %47 = vector.broadcast %c16_i32 : i32 to vector<2x16x24xi32>
    %48 = arith.cmpi slt, %45, %47 : vector<2x16x24xi32>
    %c13_i32 = arith.constant 13 : i32
    %49 = vector.broadcast %c13_i32 : i32 to vector<2x16x24xi32>
    %50 = arith.select %48, %49, %46 : vector<2x16x24xi1>, vector<2x16x24xi32>
    %c8_i32 = arith.constant 8 : i32
    %51 = vector.broadcast %c8_i32 : i32 to vector<2x16x24xi32>
    %52 = arith.cmpi slt, %45, %51 : vector<2x16x24xi32>
    %c14_i32 = arith.constant 14 : i32
    %53 = vector.broadcast %c14_i32 : i32 to vector<2x16x24xi32>
    %54 = arith.select %52, %53, %50 : vector<2x16x24xi1>, vector<2x16x24xi32>
    %55 = arith.cmpi slt, %44, %54 : vector<2x16x24xi32>
    %cst_29 = arith.constant 0xFF800000 : f32
    %56 = vector.broadcast %cst_29 : f32 to vector<2x16x24xf32>
    %57 = arith.select %55, %43, %56 : vector<2x16x24xi1>, vector<2x16x24xf32>
    %cst_30 = arith.constant dense<0xFF800000> : vector<2x24xf32>
    %58 = vector.multi_reduction <maximumf>, %57, %cst_30 [1] : vector<2x16x24xf32> to vector<2x24xf32>
    %c0_31 = arith.constant 0 : index
    %c0_32 = arith.constant 0 : index
    %59 = vector.load %arg5[%c0_31, %c0_32] : memref<24x4xf32, #tpu.memory_space<vmem>>, vector<24x4xf32>
    %cst_33 = arith.constant dense<0.000000e+00> : vector<2x4xf32>
    %60 = tpu.matmul %58, %59, %cst_33 {dimension_numbers = #tpu.dot_dimension_numbers<[1], [0], [0], [1], [0, 0, 1, 1], [], []>} : vector<2x24xf32>, vector<24x4xf32>, vector<2x4xf32> -> vector<2x4xf32>
    %c0_34 = arith.constant 0 : index
    %c0_35 = arith.constant 0 : index
    %61 = vector.load %arg6[%c0_34, %c0_35] : memref<1x4xf32, #tpu.memory_space<vmem>>, vector<1x4xf32>
    %62 = vector.broadcast %61 : vector<1x4xf32> to vector<2x4xf32>
    %63 = arith.addf %60, %62 : vector<2x4xf32>
    %c0_36 = arith.constant 0 : index
    %c0_37 = arith.constant 0 : index
    %64 = vector.load %arg7[%c0_36, %c0_37] : memref<2x4xf32, #tpu.memory_space<vmem>>, vector<2x4xf32>
    tpu.vector_store %arg7[%c0_36, %c0_37], %63 {strides = array<i32>} : memref<2x4xf32, #tpu.memory_space<vmem>>, vector<2x4xf32>,
    return
  }
  func.func @transform_0(%arg0: i32) -> (i32, i32) {
    %c0_i32 = arith.constant 0 : i32
    %c0_i32_0 = arith.constant 0 : i32
    %c0_i32_1 = arith.constant 0 : i32
    return %c0_i32, %c0_i32_0 : i32, i32
  }
  func.func @transform_1(%arg0: i32) -> (i32, i32) {
    %c0_i32 = arith.constant 0 : i32
    %c0_i32_0 = arith.constant 0 : i32
    %c0_i32_1 = arith.constant 0 : i32
    return %c0_i32, %c0_i32_0 : i32, i32
  }
  func.func @transform_2(%arg0: i32) -> (i32, i32, i32) {
    %c0_i32 = arith.constant 0 : i32
    %c0_i32_0 = arith.constant 0 : i32
    %c0_i32_1 = arith.constant 0 : i32
    %c0_i32_2 = arith.constant 0 : i32
    return %c0_i32, %c0_i32_0, %c0_i32_1 : i32, i32, i32
  }
  func.func @transform_3(%arg0: i32) -> (i32, i32) {
    %c0_i32 = arith.constant 0 : i32
    %c0_i32_0 = arith.constant 0 : i32
    %c0_i32_1 = arith.constant 0 : i32
    return %c0_i32, %c0_i32_0 : i32, i32
  }
  func.func @transform_4(%arg0: i32) -> (i32, i32) {
    %c0_i32 = arith.constant 0 : i32
    %c0_i32_0 = arith.constant 0 : i32
    %c0_i32_1 = arith.constant 0 : i32
    return %c0_i32, %c0_i32_0 : i32, i32
  }
  func.func @transform_5(%arg0: i32) -> (i32, i32) {
    %c0_i32 = arith.constant 0 : i32
    %c0_i32_0 = arith.constant 0 : i32
    %c0_i32_1 = arith.constant 0 : i32
    return %c0_i32, %c0_i32_0 : i32, i32
  }
  func.func @transform_6(%arg0: i32) -> (i32, i32) {
    %c0_i32 = arith.constant 0 : i32
    %c0_i32_0 = arith.constant 0 : i32
    %c0_i32_1 = arith.constant 0 : i32
    return %c0_i32, %c0_i32_0 : i32, i32
  }
}

</mosaic_0001>

<bundles_post_ra>
// kernel: tpu_custom_call.1
= control target key start
LH: loop header
LB: loop body
LE: loop exit
PB: predicated region body
PF: predicated region fallthrough
CT: control target
= control target key end

     0   :  { %vm74_vm0 = vcmask 1041408   ;;  %v567_v2 = vmov 0   ;;  %vm107_vm1 = vcmask 261120   ;;  %v568_v5 = vmov 0.0   ;;  %s775_s0 = inlined_call_operand.vmem [shape: s32[32,1], index: 0, kind: input, shape index: {}]   ;;  %s776_s1 = inlined_call_operand.vmem [shape: f32[50,32], index: 1, kind: input, shape index: {}]   ;;  %s777_s2 = inlined_call_operand.vmem [shape: f32[5,32,24], index: 2, kind: input, shape index: {}]   ;;  %s778_s3 = inlined_call_operand.vmem [shape: f32[1,24], index: 3, kind: input, shape index: {}]   ;;  %s779_s4 = inlined_call_operand.vmem [shape: f32[24,4], index: 4, kind: input, shape index: {}]   ;;  %s780_s5 = inlined_call_operand.vmem [shape: f32[1,4], index: 5, kind: input, shape index: {}]   ;;  %s781_s6 = inlined_call_operand.hbm [shape: f32[2,4], index: 6, kind: output, shape index: {}]  }
   0x1   :  { %v24_v0 = vld [vmem:[%s775_s0] sm:$0xff]  ;;  %v26_v1 = vld [vmem:[%s775_s0 + $0x10] sm:$0xff]  ;;  %537 = vset.pattern.permute.xlu0 %v567_v2  ;;  %538 = vset.pattern.permute.xlu1 %v567_v2  ;;  %v59_v4 = vld [vmem:[%s776_s1 + $0x28] sm:$0xff]  ;;  %112 = vst.msk [vmem:[#allocation2 + $0x20] sm:$0xff] %vm107_vm1, %v568_v5 }
   0x2   :  { %v60_v3 = vld [vmem:[%s776_s1 + $0x30] sm:$0x3]  ;;  %31 = vperm.xlu0 %537, %v24_v0   ;;  %37 = vperm.xlu1 %538, %v26_v1   ;;  %v58_v6 = vld [vmem:[%s776_s1 + $0x20] sm:$0xff] }
   0x3   :  { %483 = vmatpush.msk.msra.mxu0 %vm74_vm0, %v60_v3 }
   0x4   :  { %11 = vsyncpa [#allocation4], 0  ;;  %v57_v7 = vld [vmem:[%s776_s1 + $0x18] sm:$0xff]  ;;  %v25_v8 = vld [vmem:[%s775_s0 + $0x8] sm:$0xff]  ;;  %v28_v13 = vlaneseq  ;;  %vm61_vm2 = vcmask 408576   ;;  %vm132_vm7 = vcmask 1046528  }
   0x5   :  { %88 = vmatpush.msra.mxu0 %v59_v4  ;;  %v27_v9 = vld [vmem:[%s775_s0 + $0x18] sm:$0xff]  ;;  %v56_v10 = vld [vmem:[%s776_s1 + $0x10] sm:$0xff]  ;;  %v55_v11 = vld [vmem:[%s776_s1 + $0x8] sm:$0xff]  ;;  %vm333_vm8 = vcmask 1043456   ;;  %vm221_vm9 = vcmask 1045504   ;;  %vm277_vm10 = vcmask 1044480  }
   0x6   :  { %v54_v12 = vld [vmem:[%s776_s1] sm:$0xff]  ;;  %v641_v14 = vand.u32 127, %v28_v13  ;;  %v121_v23 = vld [vmem:[%s777_s2 + $0x18] sm:$0xff]  ;;  %v120_v24 = vld [vmem:[%s777_s2 + $0x10] sm:$0xff]  ;;  %vm409_vm14 = vcmask 195584   ;;  %vm437_vm15 = vcmask 1041409  }
   0x7   :  { %89 = vmatpush.msra.mxu0 %v58_v6  ;;  %199 = vmatpush.msra.mxu2 %v121_v23  ;;  %v119_v25 = vld [vmem:[%s777_s2 + $0x8] sm:$0xff]  ;;  %v118_v26 = vld [vmem:[%s777_s2] sm:$0xff]  ;;  %v491_v27 = vld [vmem:[%s777_s2 + $0x38] sm:$0xff]  ;;  %s570_s14 = smov [#allocation3]   ;;  %s470_s18 = sshll.u32 %s781_s6, 4  ;;  %vm461_vm0 = vcmask 25600   ;;  %s471_s18 = int_to_ptr.hbm [resolvable:$true] %s470_s18 }
   0x8   :  { %529 = vmatpush.msra.mxu3 %v121_v23  ;;  %v490_v28 = vld [vmem:[%s777_s2 + $0x30] sm:$0xff]  ;;  %525 = vmatpush.msra.mxu1 %v491_v27  ;;  %v489_v29 = vld [vmem:[%s777_s2 + $0x28] sm:$0xff]  ;;  %v488_v30 = vld [vmem:[%s777_s2 + $0x20] sm:$0xff]  ;;  %vm399_vm11 = vcmp.lt.s32.totalorder %v641_v14, 16  ;;  %vm401_vm12 = vcmp.lt.s32.totalorder %v641_v14, 8  ;;  %s468_s15 = sshll.u32 %s570_s14, 4  ;;  %s469_s15 = int_to_ptr.vmem [resolvable:$true] %s468_s15 }
   0x9   :  { %90 = vmatpush.msra.mxu0 %v57_v7  ;;  %200 = vmatpush.msra.mxu2 %v120_v24  ;;  %v519_v31 = vld [vmem:[%s777_s2 + $0x98] sm:$0xff]  ;;  %v518_v32 = vld [vmem:[%s777_s2 + $0x90] sm:$0xff]  ;;  %v517_v34 = vld [vmem:[%s777_s2 + $0x88] sm:$0xff] }
   0xa   :  { %34 = vperm.xlu0 %537, %v25_v8   ;;  %40 = vperm.xlu1 %538, %v27_v9   ;;  %v511_v33 = vld [vmem:[%s777_s2 + $0x78] sm:$0xff]  ;;  %v516_v35 = vld [vmem:[%s777_s2 + $0x80] sm:$0xff]  ;;  %v510_v38 = vld [vmem:[%s777_s2 + $0x70] sm:$0xff] }
   0xb   :  { %91 = vmatpush.msra.mxu0 %v56_v10  ;;  %530 = vmatpush.msra.mxu3 %v120_v24  ;;  %v503_v37 = vld [vmem:[%s777_s2 + $0x58] sm:$0xff]  ;;  %v502_v39 = vld [vmem:[%s777_s2 + $0x50] sm:$0xff]  ;;  %v501_v40 = vld [vmem:[%s777_s2 + $0x48] sm:$0xff] }
   0xc   :  { %201 = vmatpush.msra.mxu2 %v119_v25  ;;  %526 = vmatpush.msra.mxu1 %v490_v28  ;;  %v509_v41 = vld [vmem:[%s777_s2 + $0x68] sm:$0xff]  ;;  %v500_v42 = vld [vmem:[%s777_s2 + $0x40] sm:$0xff] }
   0xd   :  { %92 = vmatpush.msra.mxu0 %v55_v11  ;;  %531 = vmatpush.msra.mxu3 %v119_v25  ;;  %v508_v45 = vld [vmem:[%s777_s2 + $0x60] sm:$0xff] }
   0xe   :  { %202 = vmatpush.msra.mxu2 %v118_v26  ;;  %527 = vmatpush.msra.mxu1 %v489_v29  ;;  %v117_v63 = vld [vmem:[#allocation2 + $0x20] sm:$0xff] }
   0xf   :  { %93 = vmatpush.msra.mxu0 %v54_v12  ;;  %532 = vmatpush.msra.mxu3 %v118_v26  ;;  %v140_v1 = vrot.slane %v117_v63, 1  ;;  %v285_v24 = vrot.slane %v117_v63, 3 }
  0x10   :  { %528 = vmatpush.msra.mxu1 %v488_v30  ;;  %363 = vmatpush.msrb.mxu2 %v519_v31 }
  0x11   :  { %162 = vmatpush.msrb.mxu0 %v491_v27  ;;  %251 = vmatpush.msrb.mxu3 %v503_v37 }
  0x12   :  { %364 = vmatpush.msrb.mxu2 %v518_v32  ;;  %307 = vmatpush.msrb.mxu1 %v511_v33  ;;  %v430_v32 = vld [vmem:[%s779_s4 + $0x10] sm:$0xff] }
  0x13   :  { %163 = vmatpush.msrb.mxu0 %v490_v28  ;;  %252 = vmatpush.msrb.mxu3 %v502_v39  ;;  %v428_v39 = vld [vmem:[%s779_s4] sm:$0xff] }
  0x14   :  { %365 = vmatpush.msrb.mxu2 %v517_v34  ;;  %308 = vmatpush.msrb.mxu1 %v510_v38  ;;  %v429_v38 = vld [vmem:[%s779_s4 + $0x8] sm:$0xff] }
  0x15   :  { %164 = vmatpush.msrb.mxu0 %v489_v29  ;;  %253 = vmatpush.msrb.mxu3 %v501_v40 }
  0x16   :  { %366 = vmatpush.msrb.mxu2 %v516_v35  ;;  %309 = vmatpush.msrb.mxu1 %v509_v41 }
  0x17   :  { %165 = vmatpush.msrb.mxu0 %v488_v30  ;;  %254 = vmatpush.msrb.mxu3 %v500_v42 }
  0x18   :  { %310 = vmatpush.msrb.mxu1 %v508_v45 }
  0x74   :  { %v32_v15 = vpop.permute.xlu0 %31  ;;  %v38_v18 = vpop.permute.xlu1 %37 }
  0x75   :  { %vm42_vm3 = vcmp.eq.s32.totalorder %v641_v14, %v32_v15  ;;  %vm44_vm5 = vcmp.eq.s32.totalorder %v641_v14, %v38_v18  ;;  %v341_v15 = vrot.slane %v117_v63, 4 }
  0x76   :  { %v479_v16 = vsel %vm42_vm3, 1.0, %v568_v5  ;;  %v481_v20 = vsel %vm44_vm5, 1.0, %v568_v5 }
  0x77   :  { %484 = vmatmul.msk.f32.vlgmr.msra.gmra.mxu0 %vm61_vm2, %v479_v16 }
  0x7c   :  { %v35_v17 = vpop.permute.xlu0 %34  ;;  %v41_v21 = vpop.permute.xlu1 %40 }
  0x7d   :  { %vm43_vm4 = vcmp.eq.s32.totalorder %v641_v14, %v35_v17  ;;  %vm45_vm6 = vcmp.eq.s32.totalorder %v641_v14, %v41_v21 }
  0x7e   :  { %v480_v19 = vsel %vm43_vm4, 1.0, %v568_v5  ;;  %v482_v22 = vsel %vm45_vm6, 1.0, %v568_v5 }
  0x7f   :  { %485 = vmatmul.msk.f32.gmra.mxu0 %vm61_vm2, %v480_v19 }
  0x87   :  { %486 = vmatmul.msk.f32.gmra.mxu0 %vm61_vm2, %v481_v20  ;;  %v229_v20 = vrot.slane %v117_v63, 2 }
  0x8f   :  { %487 = vmatmul.msk.f32.gmra.mxu0 %vm61_vm2, %v482_v22 }
  0xf4   :  { %v95_v36 = vpop.f32.mrf.mxu0 }
  0xf5   :  { %108 = vst.msk [vmem:[#allocation2] sm:$0xff] %vm107_vm1, %v95_v36 }
  0xfc   :  { %v98_v43 = vpop.f32.mrf.mxu0  ;;  %v113_v44 = vld [vmem:[#allocation2] sm:$0xff] }
  0xfd   :  { %109 = vst.msk [vmem:[#allocation2 + $0x8] sm:$0xff] %vm107_vm1, %v98_v43  ;;  %496 = vmatmul.msk.f32.vlgmr.msra.gmra.mxu2 %vm107_vm1, %v113_v44  ;;  %v133_v48 = vrot.slane %v113_v44, 1  ;;  %v334_v56 = vrot.slane %v113_v44, 4  ;;  %v222_v0 = vrot.slane %v113_v44, 2  ;;  %v278_v10 = vrot.slane %v113_v44, 3 }
 0x104   :  { %v101_v46 = vpop.f32.mrf.mxu0  ;;  %v114_v47 = vld [vmem:[#allocation2 + $0x8] sm:$0xff] }
 0x105   :  { %110 = vst.msk [vmem:[#allocation2 + $0x10] sm:$0xff] %vm107_vm1, %v101_v46  ;;  %497 = vmatmul.msk.f32.gmra.mxu2 %vm107_vm1, %v114_v47  ;;  %v134_v49 = vrot.slane %v114_v47, 1  ;;  %v335_v55 = vrot.slane %v114_v47, 4  ;;  %v223_v61 = vrot.slane %v114_v47, 2  ;;  %v279_v7 = vrot.slane %v114_v47, 3 }
 0x106   :  { %v397_v46 = vshrl.u32 %v28_v13, 7 }
 0x107   :  { %v135_v50 = vsel %vm132_vm7, %v133_v48, %v134_v49  ;;  %v336_v58 = vsel %vm333_vm8, %v334_v56, %v335_v55  ;;  %v224_v2 = vsel %vm221_vm9, %v222_v0, %v223_v61  ;;  %v280_v11 = vsel %vm277_vm10, %v278_v10, %v279_v7 }
 0x108   :  { %492 = vmatmul.msk.f32.vlgmr.msrb.gmra.mxu0 %vm107_vm1, %v135_v50 }
 0x10c   :  { %v104_v51 = vpop.f32.mrf.mxu0  ;;  %v115_v52 = vld [vmem:[#allocation2 + $0x10] sm:$0xff] }
 0x10d   :  { %111 = vst.msk [vmem:[#allocation2 + $0x18] sm:$0xff] %vm107_vm1, %v104_v51  ;;  %498 = vmatmul.msk.f32.gmra.mxu2 %vm107_vm1, %v115_v52  ;;  %v136_v53 = vrot.slane %v115_v52, 1  ;;  %v337_v62 = vrot.slane %v115_v52, 4  ;;  %v225_v5 = vrot.slane %v115_v52, 2  ;;  %v281_v16 = vrot.slane %v115_v52, 3 }
 0x10f   :  { %v137_v54 = vsel %vm132_vm7, %v134_v49, %v136_v53  ;;  %v338_v3 = vsel %vm333_vm8, %v335_v55, %v337_v62  ;;  %v226_v8 = vsel %vm221_vm9, %v223_v61, %v225_v5  ;;  %v282_v19 = vsel %vm277_vm10, %v279_v7, %v281_v16 }
 0x110   :  { %493 = vmatmul.msk.f32.vlgmr.msra.gmra.mxu1 %vm107_vm1, %v137_v54  ;;  %v569_v49 = vmov 12   ;;  %v398_v54 = vadd.s32 8, %v397_v46 }
 0x111   :  { %v400_v50 = vsel %vm399_vm11, 13, %v569_v49 }
 0x112   :  { %v402_v56 = vsel %vm401_vm12, 14, %v400_v50 }
 0x113   :  { %vm404_vm13 = vcmp.lt.s32.totalorder %v398_v54, %v402_v56 }
 0x114   :  { %v116_v57 = vld [vmem:[#allocation2 + $0x18] sm:$0xff] }
 0x115   :  { %499 = vmatmul.msk.f32.vlgmr.msra.gmra.mxu3 %vm107_vm1, %v116_v57  ;;  %520 = vmatmul.msk.f32.vlgmr.msrb.gmra.mxu2 %vm107_vm1, %v336_v58  ;;  %v138_v59 = vrot.slane %v116_v57, 1  ;;  %v339_v6 = vrot.slane %v116_v57, 4  ;;  %v227_v12 = vrot.slane %v116_v57, 2  ;;  %v283_v21 = vrot.slane %v116_v57, 3 }
 0x116   :  { %454 = vmatpush.msra.mxu3 %v430_v32 }
 0x117   :  { %v139_v60 = vsel %vm132_vm7, %v136_v53, %v138_v59  ;;  %v141_v4 = vsel %vm132_vm7, %v138_v59, %v140_v1  ;;  %v340_v9 = vsel %vm333_vm8, %v337_v62, %v339_v6  ;;  %v228_v17 = vsel %vm221_vm9, %v225_v5, %v227_v12  ;;  %v539_v53 = vld [vmem:[%s778_s3] ss:$0 sm:$0xff] }
 0x118   :  { %494 = vmatmul.msk.f32.gmra.mxu1 %vm107_vm1, %v139_v60  ;;  %v342_v18 = vsel %vm333_vm8, %v339_v6, %v341_v15  ;;  %v230_v22 = vsel %vm221_vm9, %v227_v12, %v229_v20  ;;  %v284_v23 = vsel %vm277_vm10, %v281_v16, %v283_v21  ;;  %v286_v25 = vsel %vm277_vm10, %v283_v21, %v285_v24 }
 0x119   :  { %455 = vmatpush.msra.mxu3 %v429_v38 }
 0x11b   :  { %456 = vmatpush.msra.mxu3 %v428_v39 }
 0x11d   :  { %504 = vmatmul.msk.f32.vlgmr.msrb.gmra.mxu3 %vm107_vm1, %v224_v2  ;;  %521 = vmatmul.msk.f32.gmra.mxu2 %vm107_vm1, %v338_v3 }
 0x120   :  { %495 = vmatmul.msk.f32.gmra.mxu1 %vm107_vm1, %v141_v4 }
 0x125   :  { %505 = vmatmul.msk.f32.gmra.mxu3 %vm107_vm1, %v226_v8  ;;  %522 = vmatmul.msk.f32.gmra.mxu2 %vm107_vm1, %v340_v9 }
 0x128   :  { %512 = vmatmul.msk.f32.vlgmr.msrb.gmra.mxu1 %vm107_vm1, %v280_v11 }
 0x12d   :  { %506 = vmatmul.msk.f32.gmra.mxu3 %vm107_vm1, %v228_v17  ;;  %523 = vmatmul.msk.f32.gmra.mxu2 %vm107_vm1, %v342_v18 }
 0x130   :  { %513 = vmatmul.msk.f32.gmra.mxu1 %vm107_vm1, %v282_v19 }
 0x135   :  { %507 = vmatmul.msk.f32.gmra.mxu3 %vm107_vm1, %v230_v22 }
 0x138   :  { %514 = vmatmul.msk.f32.gmra.mxu1 %vm107_vm1, %v284_v23 }
 0x140   :  { %515 = vmatmul.msk.f32.gmra.mxu1 %vm107_vm1, %v286_v25 }
 0x180   :  { %v204_v26 = vpop.f32.mrf.mxu2 }
 0x185   :  { %v167_v36 = vpop.f32.mrf.mxu0 }
 0x186   :  { %v205_v40 = vadd.f32 %v204_v26, %v167_v36  ;;  %v540_v36 = vld [vmem:[%s780_s5] ss:$0 sm:$0xff] }
 0x188   :  { %v207_v27 = vpop.f32.mrf.mxu2 }
 0x18d   :  { %v170_v28 = vpop.f32.mrf.mxu1 }
 0x18e   :  { %v208_v43 = vadd.f32 %v207_v27, %v170_v28 }
 0x190   :  { %v210_v30 = vpop.f32.mrf.mxu2 }
 0x195   :  { %v173_v29 = vpop.f32.mrf.mxu1 }
 0x196   :  { %v211_v59 = vadd.f32 %v210_v30, %v173_v29 }
 0x198   :  { %v213_v31 = vpop.f32.mrf.mxu3  ;;  %v368_v35 = vpop.f32.mrf.mxu2 }
 0x19d   :  { %v176_v33 = vpop.f32.mrf.mxu1 }
 0x19e   :  { %v214_v4 = vadd.f32 %v213_v31, %v176_v33 }
 0x1a0   :  { %v256_v34 = vpop.f32.mrf.mxu3  ;;  %v371_v44 = vpop.f32.mrf.mxu2 }
 0x1a1   :  { %v268_v42 = vadd.f32 %v256_v34, %v205_v40 }
 0x1a5   :  { %v312_v37 = vpop.f32.mrf.mxu1 }
 0x1a6   :  { %v324_v45 = vadd.f32 %v312_v37, %v268_v42 }
 0x1a8   :  { %v259_v41 = vpop.f32.mrf.mxu3  ;;  %v380_v52 = vadd.f32 %v368_v35, %v324_v45  ;;  %v374_v61 = vpop.f32.mrf.mxu2 }
 0x1a9   :  { %v269_v47 = vadd.f32 %v259_v41, %v208_v43 }
 0x1aa   :  { %v388_v60 = vadd.f32 %v539_v53, %v380_v52 }
 0x1ac   :  { %v392_v0 = vmax.f32 %v388_v60, 0.0 }
 0x1ad   :  { %v315_v48 = vpop.f32.mrf.mxu1 }
 0x1ae   :  { %v325_v51 = vadd.f32 %v315_v48, %v269_v47  ;;  %v410_v6 = vsel %vm409_vm14, %v392_v0, -inf }
 0x1b0   :  { %v381_v55 = vadd.f32 %v371_v44, %v325_v51  ;;  %v262_v57 = vpop.f32.mrf.mxu3  ;;  %v377_v11 = vpop.f32.mrf.mxu2 }
 0x1b1   :  { %v270_v62 = vadd.f32 %v262_v57, %v211_v59 }
 0x1b2   :  { %v389_v58 = vadd.f32 %v539_v53, %v381_v55 }
 0x1b4   :  { %v393_v13 = vmax.f32 %v389_v58, 0.0 }
 0x1b5   :  { %v318_v63 = vpop.f32.mrf.mxu1 }
 0x1b6   :  { %v406_v14 = vsel %vm404_vm13, %v393_v13, -inf  ;;  %v326_v1 = vadd.f32 %v318_v63, %v270_v62 }
 0x1b7   :  { %v411_v3 = vsel %vm409_vm14, %v406_v14, -inf }
 0x1b8   :  { %v265_v2 = vpop.f32.mrf.mxu3  ;;  %v382_v5 = vadd.f32 %v374_v61, %v326_v1  ;;  %v412_v8 = vmax.f32 %v410_v6, %v411_v3 }
 0x1b9   :  { %v271_v7 = vadd.f32 %v265_v2, %v214_v4 }
 0x1ba   :  { %v390_v12 = vadd.f32 %v539_v53, %v382_v5  ;;  %v413_v16 = vrot.slane %v412_v8, 4 }
 0x1bc   :  { %v394_v18 = vmax.f32 %v390_v12, 0.0  ;;  %v414_v20 = vmax.f32 %v412_v8, %v413_v16 }
 0x1bd   :  { %v321_v9 = vpop.f32.mrf.mxu1 }
 0x1be   :  { %v327_v10 = vadd.f32 %v321_v9, %v271_v7  ;;  %v419_v22 = vsel %vm409_vm14, %v394_v18, -inf  ;;  %v415_v24 = vrot.slane %v414_v20, 2 }
 0x1c0   :  { %v383_v15 = vadd.f32 %v377_v11, %v327_v10  ;;  %v416_v27 = vmax.f32 %v414_v20, %v415_v24 }
 0x1c2   :  { %v391_v17 = vadd.f32 %v539_v53, %v383_v15  ;;  %v417_v30 = vrot.slane %v416_v27, 1 }
 0x1c4   :  { %v395_v19 = vmax.f32 %v391_v17, 0.0  ;;  %v418_v33 = vmax.f32 %v416_v27, %v417_v30 }
 0x1c6   :  { %v408_v21 = vsel %vm404_vm13, %v395_v19, -inf }
 0x1c7   :  { %v420_v23 = vsel %vm409_vm14, %v408_v21, -inf }
 0x1c8   :  { %v421_v25 = vmax.f32 %v419_v22, %v420_v23 }
 0x1ca   :  { %v422_v26 = vrot.slane %v421_v25, 4 }
 0x1cc   :  { %v423_v28 = vmax.f32 %v421_v25, %v422_v26 }
 0x1ce   :  { %v424_v29 = vrot.slane %v423_v28, 2 }
 0x1d0   :  { %v425_v31 = vmax.f32 %v423_v28, %v424_v29 }
 0x1d2   :  { %v426_v32 = vrot.slane %v425_v31, 1 }
 0x1d4   :  { %v427_v34 = vmax.f32 %v425_v31, %v426_v32 }
 0x1d6   :  { %v438_v35 = vsel %vm437_vm15, %v427_v34, %v418_v33 }
 0x1d7   :  { %524 = vmatmul.msk.f32.vlgmr.msra.gmra.mxu3 %vm409_vm14, %v438_v35 }
 0x25a   :  { %v458_v37 = vpop.f32.mrf.mxu3 }
 0x25b   :  { %v459_v38 = vadd.f32 %v540_v36, %v458_v37 }
 0x25d   :  { %462 = vst.msk [vmem:[#allocation3] sm:$0x3] %vm461_vm0, %v459_v38 }
 0x25e   :  { %473 = dma.vmem_to_hbm [thread:$0]  %s469_s15, 32, %s471_s18, [#allocation4]  }
 0x25f   :  { %565 = dma.done.wait [#allocation4], 32  }
 0x260   :  { %566 = vsyncadd [#allocation4], 4294967264 }
 0x261   :  { %478 = vsyncpa [#allocation4], 1 }

</bundles_post_ra>
